<compile_context>
chip_gen: v6e
topology: v6e:2x2x1
jax: 0.10.0
libtpu: 0.0.40
codegen_flags: <defaults>
</compile_context>

<pallas_src>
import jax
import jax.numpy as jnp
from jax import lax
from jax.experimental import pallas as pl
from jax.experimental.pallas import tpu as pltpu


def _round_up(x, m):
    return ((x + m - 1) // m) * m


# ----------------------------------------------------------------------------
# Pallas kernel: fused multi-head MLP (Linear -> ELU -> ... -> Linear)
# ----------------------------------------------------------------------------
def _elu_f32(z):
    # ELU(alpha=1).  exp(z) on the discarded (z > 0) lane may overflow to +inf
    # for large z, but jnp.where selects the linear branch there, so no NaN
    # escapes.  Do NOT "optimize" this into an arithmetic blend.
    return jnp.where(z > 0, z, jnp.exp(z) - 1.0)


def _make_fused_heads_kernel(mode, num_layers, num_heads):
    """mode == 'dense': L packed (w, b) pairs, one matmul per layer.
       mode == 'perhead': L * H (w, b) pairs (layer-major, head-minor); the
       activations are carried as a list of per-head blocks and the last layer
       is computed as a sum of per-head matmuls into the packed logit slab."""

    def kernel(*refs):
        x_ref = refs[0]
        o_ref = refs[-1]
        p = refs[1:-1]
        x = x_ref[...]                                   # (TB, din_pad) bf16

        def layer(h, w_ref, b_ref, last):
            z = jnp.dot(h, w_ref[...], preferred_element_type=jnp.float32)
            z = z + b_ref[...]
            if last:
                return z
            return _elu_f32(z).astype(jnp.bfloat16)      # MXU-native next input

        if mode == "dense":
            h = x
            for l in range(num_layers):
                h = layer(h, p[2 * l], p[2 * l + 1], l == num_layers - 1)
            out = h
        else:                                            # "perhead"
            idx = 0
            parts = []
            for _ in range(num_heads):                   # layer 0 (per head)
                parts.append(layer(x, p[idx], p[idx + 1], False))
                idx += 2
            for _ in range(1, num_layers - 1):           # middle layers
                parts = [layer(parts[i], p[idx + 2 * i], p[idx + 2 * i + 1],
                               False) for i in range(num_heads)]
                idx += 2 * num_heads
            out = None                                    # last layer (sum)
            for i in range(num_heads):
                zi = layer(parts[i], p[idx], p[idx + 1], True)
                idx += 2
                out = zi if out is None else out + zi
        o_ref[...] = out.astype(o_ref.dtype)

    return kernel


# ----------------------------------------------------------------------------
# Packing: every head's per-layer (W, b) -> lane-aligned fused parameters
# ----------------------------------------------------------------------------
def pack_heads_params(heads, input_units):
    """heads: list of heads, each a list of (W[in,out], b[out]) Linear layers.
    All heads share num_layers / hidden_units (true for DANN).

    Returns (packed_layers, meta): packed_layers is a flat list of
    (W_bf16, b_f32) consumed positionally by the kernel; meta is static."""
    num_heads = len(heads)
    num_layers = len(heads[0])
    assert all(len(h) == num_layers for h in heads), "heads must share num_layers"

    din_pad = _round_up(input_units, 128)
    out_sizes = [int(h[-1][0].shape[1]) for h in heads]
    col_offs = [0]
    for s in out_sizes:
        col_offs.append(col_offs[-1] + s)
    total_out = col_offs[-1]
    n_out_pad = _round_up(max(total_out, 1), 128)

    if num_layers > 1:
        hidden = int(heads[0][0][0].shape[1])
        assert all(int(h[0][0].shape[1]) == hidden for h in heads), \
            "heads must share hidden_units"
    else:
        hidden = 0

    # Per-head small matmuls are only worthwhile (and lane-clean) when there
    # are middle layers and hidden is a multiple of 128.
    perhead = (num_layers > 2) and (hidden % 128 == 0)

    layers = []
    if num_layers == 1:
        w_all = jnp.zeros((din_pad, n_out_pad), jnp.float32)
        b_all = jnp.zeros((1, n_out_pad), jnp.float32)
        for i, head in enumerate(heads):
            w, b = head[0]
            c0 = col_offs[i]
            w_all = w_all.at[: w.shape[0], c0:c0 + w.shape[1]].set(w)
            b_all = b_all.at[0, c0:c0 + b.shape[0]].set(b)
        layers.append((w_all.astype(jnp.bfloat16), b_all))
    elif perhead:
        # layer 0: per-head (din_pad, hidden)
        for head in heads:
            w, b = head[0]
            w_p = jnp.zeros((din_pad, hidden), jnp.float32)
            w_p = w_p.at[: w.shape[0], :].set(w)
            layers.append((w_p.astype(jnp.bfloat16),
                           b.reshape(1, -1).astype(jnp.float32)))
        # middle layers: per-head (hidden, hidden), no padding needed
        for l in range(1, num_layers - 1):
            for head in heads:
                w, b = head[l]
                layers.append((w.astype(jnp.bfloat16),
                               b.reshape(1, -1).astype(jnp.float32)))
        # last layer: per-head (hidden, n_out_pad), head's columns at col_offs[i]
        for i, head in enumerate(heads):
            w, b = head[num_layers - 1]
            c0 = col_offs[i]
            w_p = jnp.zeros((hidden, n_out_pad), jnp.float32)
            w_p = w_p.at[:, c0:c0 + w.shape[1]].set(w)
            b_p = jnp.zeros((1, n_out_pad), jnp.float32)
            b_p = b_p.at[0, c0:c0 + b.shape[0]].set(b)
            layers.append((w_p.astype(jnp.bfloat16), b_p))
    else:
        # Dense path with CONTIGUOUS per-head hidden columns (offset i*hidden);
        # only the total width is rounded up to 128 lanes.
        hid_total = num_heads * hidden
        hid_pad = _round_up(hid_total, 128)

        # layer 0: shared feature -> contiguous per-head hidden blocks
        w_all = jnp.zeros((din_pad, hid_pad), jnp.float32)
        b_all = jnp.zeros((1, hid_pad), jnp.float32)
        for i, head in enumerate(heads):
            w, b = head[0]
            c0 = i * hidden
            w_all = w_all.at[: w.shape[0], c0:c0 + w.shape[1]].set(w)
            b_all = b_all.at[0, c0:c0 + b.shape[0]].set(b)
        layers.append((w_all.astype(jnp.bfloat16), b_all))

        # middle layers: block-diagonal at contiguous offsets (small hidden,
        # so the padding waste is at most one 128-lane block total)
        for l in range(1, num_layers - 1):
            w_all = jnp.zeros((hid_pad, hid_pad), jnp.float32)
            b_all = jnp.zeros((1, hid_pad), jnp.float32)
            for i, head in enumerate(heads):
                w, b = head[l]
                r0 = i * hidden
                w_all = w_all.at[r0:r0 + w.shape[0], r0:r0 + w.shape[1]].set(w)
                b_all = b_all.at[0, r0:r0 + b.shape[0]].set(b)
            layers.append((w_all.astype(jnp.bfloat16), b_all))

        # last layer: per-head hidden rows -> packed logit columns
        w_all = jnp.zeros((hid_pad, n_out_pad), jnp.float32)
        b_all = jnp.zeros((1, n_out_pad), jnp.float32)
        for i, head in enumerate(heads):
            w, b = head[num_layers - 1]
            r0 = i * hidden
            c0 = col_offs[i]
            w_all = w_all.at[r0:r0 + w.shape[0], c0:c0 + w.shape[1]].set(w)
            b_all = b_all.at[0, c0:c0 + b.shape[0]].set(b)
        layers.append((w_all.astype(jnp.bfloat16), b_all))

    meta = {
        "mode": "perhead" if perhead else "dense",
        "num_layers": num_layers,
        "num_heads": num_heads,
        "din_pad": din_pad,
        "n_out_pad": n_out_pad,
        "head_slices": [(col_offs[i], out_sizes[i]) for i in range(num_heads)],
    }
    return layers, meta


def _vmem_budget_bytes(packed_layers, tb, din_pad, n_out_pad):
    w_bytes = 0
    max_cols = n_out_pad
    for w, b in packed_layers:
        w_bytes += w.size * w.dtype.itemsize + b.size * b.dtype.itemsize
        max_cols = max(max_cols, int(w.shape[1]))
    io_bytes = 2 * tb * din_pad * 2 + 2 * tb * n_out_pad * 4   # x/out, 2 bufs
    act_bytes = 4 * tb * (din_pad + 2 * max_cols) * 4          # f32 intermediates
    need = int(1.5 * (w_bytes + io_bytes + act_bytes)) + (2 << 20)
    # Never below any chip's default scoped limit; never above v7x physical.
    return min(max(need, 32 << 20), 64 << 20)


def _const_spec(shape):
    """Grid-invariant block (index_map always (0,0)): single-buffer it."""
    try:
        return pl.BlockSpec(shape, lambda i: (0, 0), pipeline_mode=pl.Buffered(1))
    except TypeError:                                    # older BlockSpec signature
        return pl.BlockSpec(shape, lambda i: (0, 0))


def fused_heads_forward(feature, packed_layers, meta):
    """feature: (B, input_units) f32.  Returns a list of per-head logits (f32)."""
    b, din = feature.shape
    din_pad = meta["din_pad"]
    n_out_pad = meta["n_out_pad"]

    # bf16 packs 2 rows per sublane -> batch tile a multiple of 16.  Grow the
    # tile to 256 (fills the 256-wide MXU on v6e/v7x); larger batches then get
    # >= 2 grid steps so the "parallel" axis has megacore work on v7x.
    b16 = _round_up(max(b, 16), 16)
    tb = b16 if b16 <= 256 else 256
    b_pad = _round_up(b16, tb)

    x = jnp.zeros((b_pad, din_pad), jnp.bfloat16)
    x = x.at[:b, :din].set(feature.astype(jnp.bfloat16))

    args = [x]
    in_specs = [pl.BlockSpec((tb, din_pad), lambda i: (i, 0))]
    for w, bias in packed_layers:
        args.append(w)
        args.append(bias)
        in_specs.append(_const_spec(w.shape))
        in_specs.append(_const_spec(bias.shape))

    # TODO(synk): if a single packed weight ever approaches the VMEM budget
    # (very large hidden_units * num_heads), add an N-tiling grid axis over the
    # weight's output columns instead of feeding whole weights as one block.
    kernel = _make_fused_heads_kernel(meta["mode"], meta["num_layers"],
                                      meta["num_heads"])
    out = pl.pallas_call(
        kernel,
        grid=(b_pad // tb,),
        in_specs=in_specs,
        out_specs=pl.BlockSpec((tb, n_out_pad), lambda i: (i, 0)),
        out_shape=jax.ShapeDtypeStruct((b_pad, n_out_pad), jnp.float32),
        compiler_params=pltpu.CompilerParams(
            dimension_semantics=("parallel",),
            vmem_limit_bytes=_vmem_budget_bytes(packed_layers, tb, din_pad,
                                                n_out_pad),
        ),
    )(*args)

    # Lane-dense slab -> per-head logits (wrapper-side slicing is free plumbing).
    return [out[:b, off:off + sz] for off, sz in meta["head_slices"]]


# ----------------------------------------------------------------------------
# EEGNet-style feature extractor (plain XLA glue, eval-mode BN folded at init).
# TODO(synk): EEGNetBackbone source was not provided; a standard EEGNet conv
#             stack is used (temporal conv -> [BN folded] -> depthwise spatial
#             conv -> [BN folded] -> ELU -> AvgPool4 -> separable conv ->
#             [BN folded] -> ELU -> AvgPool8), PyTorch-style padding=(0,k//2)
#             and floor-dividing average pooling; dropout is eval-mode identity.
# ----------------------------------------------------------------------------
def _elu(x):
    return jnp.where(x > 0, x, jnp.exp(x) - 1.0)


def _avg_pool_time(h, k):
    # PyTorch AvgPool2d((1, k)): floor division on the time axis.
    b, c, hh, t = h.shape
    to = t // k
    return h[..., : to * k].reshape(b, c, hh, to, k).mean(axis=-1)


def eegnet_backbone(x, p, f1, d, kern1, kern2):
    dn = ("NCHW", "OIHW", "NCHW")
    # Block 1: temporal conv (padding = kern1 // 2), BN pre-folded into weights
    h = lax.conv_general_dilated(
        x, p["conv1_w"], (1, 1), [(0, 0), (kern1 // 2, kern1 // 2)],
        dimension_numbers=dn)
    h = h + p["conv1_b"][None, :, None, None]
    # Depthwise spatial conv over the EEG-channel (height) axis, BN folded
    h = lax.conv_general_dilated(
        h, p["dw_w"], (1, 1), "VALID", dimension_numbers=dn,
        feature_group_count=f1)
    h = h + p["dw_b"][None, :, None, None]
    h = _elu(h)
    h = _avg_pool_time(h, 4)
    # Block 2: separable conv = depthwise temporal + pointwise, BN folded
    h = lax.conv_general_dilated(
        h, p["sep_dw_w"], (1, 1), [(0, 0), (kern2 // 2, kern2 // 2)],
        dimension_numbers=dn, feature_group_count=f1 * d)
    h = lax.conv_general_dilated(
        h, p["sep_pw_w"], (1, 1), "VALID", dimension_numbers=dn)
    h = h + p["sep_pw_b"][None, :, None, None]
    h = _elu(h)
    h = _avg_pool_time(h, 8)
    return h  # (B, F2, 1, T_out)


# ----------------------------------------------------------------------------
# DANN forward (jittable; static config captured in a closure)
# ----------------------------------------------------------------------------
def make_dann_forward(meta):
    f1, d = meta["f1"], meta["d"]
    kern1, kern2 = meta["kern1"], meta["kern2"]

    def forward(params, x, alpha=1.0):
        feature = eegnet_backbone(x, params["backbone"], f1, d, kern1, kern2)
        feature = feature.reshape(feature.shape[0], -1)
        # ReverseLayerF.apply(feature, alpha): identity in the forward pass, so
        # the task head and all discriminator heads consume the same feature and
        # are evaluated in a single fused Pallas call (one feature DMA).
        head_outs = fused_heads_forward(feature, params["heads"], meta)
        class_output = head_outs[0]
        discriminator_output = head_outs[1:]
        return class_output, discriminator_output

    return jax.jit(forward)


# ----------------------------------------------------------------------------
# Deterministic parameter construction (BN folded into conv weights at init)
# ----------------------------------------------------------------------------
def init_params(key, *, chans, samples, f1, d, f2, kern1, kern2,
                task_classes, disc_classes, hidden_units, num_layers):
    keys = iter(jax.random.split(key, 16))
    scale = 0.1

    def fold_bn(w, gamma, beta, mean, var, eps=1e-5):
        s = gamma / jnp.sqrt(var + eps)
        return w * s[:, None, None, None], beta - mean * s

    bb = {}
    conv1_w = scale * jax.random.normal(next(keys), (f1, 1, 1, kern1), jnp.float32)
    bn1 = (jnp.ones(f1), jnp.zeros(f1), jnp.zeros(f1), jnp.ones(f1))
    bb["conv1_w"], bb["conv1_b"] = fold_bn(conv1_w, *bn1)

    dw_w = scale * jax.random.normal(next(keys), (f1 * d, 1, chans, 1), jnp.float32)
    bn2 = (jnp.ones(f1 * d), jnp.zeros(f1 * d), jnp.zeros(f1 * d), jnp.ones(f1 * d))
    bb["dw_w"], bb["dw_b"] = fold_bn(dw_w, *bn2)

    bb["sep_dw_w"] = scale * jax.random.normal(next(keys), (f1 * d, 1, 1, kern2),
                                               jnp.float32)
    sep_pw_w = scale * jax.random.normal(next(keys), (f2, f1 * d, 1, 1), jnp.float32)
    bn3 = (jnp.ones(f2), jnp.zeros(f2), jnp.zeros(f2), jnp.ones(f2))
    bb["sep_pw_w"], bb["sep_pw_b"] = fold_bn(sep_pw_w, *bn3)

    # feature_shape = (f2, 1, t4), matching the backbone above
    t1 = samples + 2 * (kern1 // 2) - kern1 + 1
    t2 = t1 // 4
    t3 = t2 + 2 * (kern2 // 2) - kern2 + 1
    t4 = t3 // 8
    feat_units = f2 * 1 * t4  # np.array(feature_shape).prod()

    def make_mlp(k, din, num_classes):
        dims = [din] + [hidden_units] * (num_layers - 1) + [num_classes]
        ks = jax.random.split(k, 2 * num_layers)
        return [
            (scale * jax.random.normal(ks[2 * l], (dims[l], dims[l + 1]), jnp.float32),
             scale * jax.random.normal(ks[2 * l + 1], (dims[l + 1],), jnp.float32))
            for l in range(num_layers)
        ]

    task = make_mlp(next(keys), feat_units, task_classes)
    disc = [make_mlp(next(keys), feat_units, c) for c in disc_classes]

    # Head order in the fused kernel: [task, disc_0, disc_1, ...]
    packed_layers, head_meta = pack_heads_params([task] + disc, feat_units)

    params = {"backbone": bb, "heads": packed_layers}
    meta = dict(f1=f1, d=d, kern1=kern1, kern2=kern2,
                feat_units=feat_units, **head_meta)
    return params, meta


# ----------------------------------------------------------------------------
# Pure-JAX reference for the fused multi-head MLP (numerics check)
# ----------------------------------------------------------------------------
def _ref_heads(feature, heads):
    outs = []
    for head in heads:
        h = feature
        for l, (w, b) in enumerate(head):
            h = h @ w + b
            if l < len(head) - 1:
                h = jnp.where(h > 0, h, jnp.exp(h) - 1.0)
        outs.append(h)
    return outs


if __name__ == "__main__":
    # ---- Test 1: full DANN forward (multi-discriminator branch) ------------
    # batch=2, 1 "image" channel, 8 EEG channels, 128 samples -> feature map
    # (2, 8, 1, 4) -> 32 feature units.
    B, CH, T = 2, 8, 128
    F1, D, F2 = 4, 2, 8
    KERN1, KERN2 = 16, 8

    x = jax.random.normal(jax.random.PRNGKey(0), (B, 1, CH, T), jnp.float32)
    params, meta = init_params(
        jax.random.PRNGKey(1),
        chans=CH, samples=T, f1=F1, d=D, f2=F2, kern1=KERN1, kern2=KERN2,
        task_classes=4, disc_classes=[2, 3],   # multi-discriminator branch
        hidden_units=32, num_layers=2,
    )
    dann_forward = make_dann_forward(meta)
    class_out, disc_out = dann_forward(params, x, 1.0)
    jax.block_until_ready(class_out)
    for o in disc_out:
        jax.block_until_ready(o)
    assert class_out.shape == (B, 4)
    assert [o.shape for o in disc_out] == [(B, 2), (B, 3)]
    assert bool(jnp.all(jnp.isfinite(class_out)))

    # ---- Test 2: fused heads vs pure-JAX reference (both packing modes) ----
    def make_heads(k, din, class_list, hidden, layers, scale=0.1):
        heads = []
        ks = jax.random.split(k, len(class_list))
        for kk, nc in zip(ks, class_list):
            dims = [din] + [hidden] * (layers - 1) + [nc]
            kw = jax.random.split(kk, 2 * layers)
            heads.append([
                (scale * jax.random.normal(kw[2 * l], (dims[l], dims[l + 1]), jnp.float32),
                 scale * jax.random.normal(kw[2 * l + 1], (dims[l + 1],), jnp.float32))
                for l in range(layers)])
        return heads

    feat = jax.random.normal(jax.random.PRNGKey(2), (4, 200), jnp.float32)
    test_cfgs = [([4, 2, 3], 32, 2),    # dense contiguous-packed path
                 ([4, 2], 128, 3)]      # per-head (num_layers>2, hidden%128==0)
    for class_list, hidden, layers in test_cfgs:
        heads = make_heads(jax.random.PRNGKey(3), 200, class_list, hidden, layers)
        packed, hm = pack_heads_params(heads, 200)
        got = fused_heads_forward(feat, packed, hm)
        want = _ref_heads(feat, heads)
        for g, w_ in zip(got, want):
            jax.block_until_ready(g)
            assert g.shape == w_.shape
            # bf16 weights/activations vs f32 reference -> loose tolerance.
            assert bool(jnp.allclose(g, w_, atol=5e-2, rtol=5e-2)), (
                "max abs err = %f" % float(jnp.max(jnp.abs(g - w_))))

    print("KERNEL_OK")
</pallas_src>

<mosaic_0001>
module attributes {stable_mosaic.version = 11 : i64} {
  func.func @kernel(%arg0: i32, %arg1: memref<16x128xbf16, #tpu.memory_space<vmem>>, %arg2: memref<128x128xbf16, #tpu.memory_space<vmem>>, %arg3: memref<1x128xf32, #tpu.memory_space<vmem>>, %arg4: memref<128x128xbf16, #tpu.memory_space<vmem>>, %arg5: memref<1x128xf32, #tpu.memory_space<vmem>>, %arg6: memref<16x128xf32, #tpu.memory_space<vmem>>) attributes {dimension_semantics = [#tpu.dimension_semantics<parallel>], iteration_bounds = array<i64: 1>, scalar_prefetch = 0 : i64, scratch_operands = 0 : i64, tpu.core_type = #tpu.core_type<tc>, window_params = [{transform_indices = @transform_0, window_bounds = array<i64: 16, 128>}, {pipeline_mode = #tpu.pipeline_mode<synchronous>, transform_indices = @transform_1, window_bounds = array<i64: 128, 128>}, {pipeline_mode = #tpu.pipeline_mode<synchronous>, transform_indices = @transform_2, window_bounds = array<i64: 1, 128>}, {pipeline_mode = #tpu.pipeline_mode<synchronous>, transform_indices = @transform_3, window_bounds = array<i64: 128, 128>}, {pipeline_mode = #tpu.pipeline_mode<synchronous>, transform_indices = @transform_4, window_bounds = array<i64: 1, 128>}, {transform_indices = @transform_5, window_bounds = array<i64: 16, 128>}]} {
    %c0 = arith.constant 0 : index
    %c0_0 = arith.constant 0 : index
    %0 = vector.load %arg1[%c0, %c0_0] : memref<16x128xbf16, #tpu.memory_space<vmem>>, vector<16x128xbf16>
    %c0_1 = arith.constant 0 : index
    %c0_2 = arith.constant 0 : index
    %1 = vector.load %arg2[%c0_1, %c0_2] : memref<128x128xbf16, #tpu.memory_space<vmem>>, vector<128x128xbf16>
    %cst = arith.constant dense<0.000000e+00> : vector<16x128xf32>
    %2 = tpu.matmul %0, %1, %cst {dimension_numbers = #tpu.dot_dimension_numbers<[1], [0], [0], [1], [0, 0, 1, 1], [], []>} : vector<16x128xbf16>, vector<128x128xbf16>, vector<16x128xf32> -> vector<16x128xf32>
    %c0_3 = arith.constant 0 : index
    %c0_4 = arith.constant 0 : index
    %3 = vector.load %arg3[%c0_3, %c0_4] : memref<1x128xf32, #tpu.memory_space<vmem>>, vector<1x128xf32>
    %4 = vector.broadcast %3 : vector<1x128xf32> to vector<16x128xf32>
    %5 = arith.addf %2, %4 : vector<16x128xf32>
    %cst_5 = arith.constant 0.000000e+00 : f32
    %6 = vector.broadcast %cst_5 : f32 to vector<16x128xf32>
    %7 = arith.cmpf ogt, %5, %6 : vector<16x128xf32>
    %8 = math.exp %5 : vector<16x128xf32>
    %cst_6 = arith.constant 1.000000e+00 : f32
    %9 = vector.broadcast %cst_6 : f32 to vector<16x128xf32>
    %10 = arith.subf %8, %9 : vector<16x128xf32>
    %11 = arith.select %7, %5, %10 : vector<16x128xi1>, vector<16x128xf32>
    %12 = arith.truncf %11 : vector<16x128xf32> to vector<16x128xbf16>
    %c0_7 = arith.constant 0 : index
    %c0_8 = arith.constant 0 : index
    %13 = vector.load %arg4[%c0_7, %c0_8] : memref<128x128xbf16, #tpu.memory_space<vmem>>, vector<128x128xbf16>
    %cst_9 = arith.constant dense<0.000000e+00> : vector<16x128xf32>
    %14 = tpu.matmul %12, %13, %cst_9 {dimension_numbers = #tpu.dot_dimension_numbers<[1], [0], [0], [1], [0, 0, 1, 1], [], []>} : vector<16x128xbf16>, vector<128x128xbf16>, vector<16x128xf32> -> vector<16x128xf32>
    %c0_10 = arith.constant 0 : index
    %c0_11 = arith.constant 0 : index
    %15 = vector.load %arg5[%c0_10, %c0_11] : memref<1x128xf32, #tpu.memory_space<vmem>>, vector<1x128xf32>
    %16 = vector.broadcast %15 : vector<1x128xf32> to vector<16x128xf32>
    %17 = arith.addf %14, %16 : vector<16x128xf32>
    %c0_12 = arith.constant 0 : index
    %c0_13 = arith.constant 0 : index
    %18 = vector.load %arg6[%c0_12, %c0_13] : memref<16x128xf32, #tpu.memory_space<vmem>>, vector<16x128xf32>
    tpu.vector_store %arg6[%c0_12, %c0_13], %17 {strides = array<i32>} : memref<16x128xf32, #tpu.memory_space<vmem>>, vector<16x128xf32>,
    return
  }
  func.func @transform_0(%arg0: i32) -> (i32, i32) {
    %c0_i32 = arith.constant 0 : i32
    %c0_i32_0 = arith.constant 0 : i32
    return %arg0, %c0_i32 : i32, i32
  }
  func.func @transform_1(%arg0: i32) -> (i32, i32) {
    %c0_i32 = arith.constant 0 : i32
    %c0_i32_0 = arith.constant 0 : i32
    %c0_i32_1 = arith.constant 0 : i32
    return %c0_i32, %c0_i32_0 : i32, i32
  }
  func.func @transform_2(%arg0: i32) -> (i32, i32) {
    %c0_i32 = arith.constant 0 : i32
    %c0_i32_0 = arith.constant 0 : i32
    %c0_i32_1 = arith.constant 0 : i32
    return %c0_i32, %c0_i32_0 : i32, i32
  }
  func.func @transform_3(%arg0: i32) -> (i32, i32) {
    %c0_i32 = arith.constant 0 : i32
    %c0_i32_0 = arith.constant 0 : i32
    %c0_i32_1 = arith.constant 0 : i32
    return %c0_i32, %c0_i32_0 : i32, i32
  }
  func.func @transform_4(%arg0: i32) -> (i32, i32) {
    %c0_i32 = arith.constant 0 : i32
    %c0_i32_0 = arith.constant 0 : i32
    %c0_i32_1 = arith.constant 0 : i32
    return %c0_i32, %c0_i32_0 : i32, i32
  }
  func.func @transform_5(%arg0: i32) -> (i32, i32) {
    %c0_i32 = arith.constant 0 : i32
    %c0_i32_0 = arith.constant 0 : i32
    return %arg0, %c0_i32 : i32, i32
  }
}

</mosaic_0001>

<bundles_post_ra>
// kernel: forward.1
= control target key start
LH: loop header
LB: loop body
LE: loop exit
PB: predicated region body
PF: predicated region fallthrough
CT: control target
= control target key end

     0   :  { %v372_v0 = vmov 0.0   ;;  %vm373_vm0 = vmmov 0   ;;  %s467_s1 = inlined_call_operand.vmem [shape: bf16[128,128], index: 1, kind: input, shape index: {}]   ;;  %s468_s3 = inlined_call_operand.vmem [shape: bf16[128,128], index: 3, kind: input, shape index: {}]   ;;  %s469_s0 = inlined_call_operand.vmem [shape: bf16[16,128], index: 0, kind: input, shape index: {}]   ;;  %s470_s2 = inlined_call_operand.vmem [shape: f32[1,128], index: 2, kind: input, shape index: {}]   ;;  %s471_s4 = inlined_call_operand.vmem [shape: f32[1,128], index: 4, kind: input, shape index: {}]   ;;  %s472_s5 = inlined_call_operand.vmem [shape: f32[16,128], index: 5, kind: output, shape index: {}]  }
   0x1   :  { %309 = vmatprep.subr.bf16.mxu0 %v372_v0  ;;  %v351_v1 = vld [vmem:[%s467_s1 + $0x38] sm:$0xff]   ;;  %325 = vmatprep.mubr.msk.bf16.mxu0 %vm373_vm0, %v372_v0  ;;  %v352_v2 = vld [vmem:[%s467_s1 + $0x30] sm:$0xff]   ;;  %v353_v3 = vld [vmem:[%s467_s1 + $0x28] sm:$0xff]  }
   0x2   :  { %329 = vmatprep.subr.bf16.mxu1 %v372_v0  ;;  %345 = vmatprep.mubr.msk.bf16.mxu1 %vm373_vm0, %v372_v0  ;;  %v360_v4 = vld [vmem:[%s468_s3 + $0x38] sm:$0xff]   ;;  %v354_v5 = vld [vmem:[%s467_s1 + $0x20] sm:$0xff]   ;;  %v356_v7 = vld [vmem:[%s467_s1 + $0x10] sm:$0xff]  }
   0x3   :  { %310 = vmatpush3.bf16.msra.mxu0 %v351_v1  ;;  %330 = vmatpush3.bf16.msra.mxu1 %v360_v4  ;;  %v355_v6 = vld [vmem:[%s467_s1 + $0x18] sm:$0xff]   ;;  %v357_v8 = vld [vmem:[%s467_s1 + $0x8] sm:$0xff]   ;;  %v358_v9 = vld [vmem:[%s467_s1] sm:$0xff]  }
   0x4   :  { %311 = vmatprep.subr.bf16.mxu0 %v372_v0  ;;  %331 = vmatprep.subr.bf16.mxu1 %v372_v0  ;;  %v359_v10 = vld [vmem:[%s469_s0] sm:$0xff]   ;;  %v361_v11 = vld [vmem:[%s468_s3 + $0x30] sm:$0xff]   ;;  %v362_v12 = vld [vmem:[%s468_s3 + $0x28] sm:$0xff]  }
   0x5   :  { %v363_v13 = vld [vmem:[%s468_s3 + $0x20] sm:$0xff]   ;;  %v364_v14 = vld [vmem:[%s468_s3 + $0x18] sm:$0xff]   ;;  %v365_v15 = vld [vmem:[%s468_s3 + $0x10] sm:$0xff]  }
   0x6   :  { %v366_v16 = vld [vmem:[%s468_s3 + $0x8] sm:$0xff]   ;;  %v367_v17 = vld [vmem:[%s468_s3] sm:$0xff]  }
   0x7   :  { %312 = vmatpush3.bf16.msra.mxu0 %v352_v2  ;;  %332 = vmatpush3.bf16.msra.mxu1 %v361_v11  ;;  %v270_v18 = vld [vmem:[%s470_s2] ss:$0 sm:$0xff] }
   0x8   :  { %313 = vmatprep.subr.bf16.mxu0 %v372_v0  ;;  %333 = vmatprep.subr.bf16.mxu1 %v372_v0  ;;  %v282_v34 = vld [vmem:[%s471_s4] ss:$0 sm:$0xff] }
   0xb   :  { %314 = vmatpush3.bf16.msra.mxu0 %v353_v3  ;;  %334 = vmatpush3.bf16.msra.mxu1 %v362_v12 }
   0xc   :  { %315 = vmatprep.subr.bf16.mxu0 %v372_v0  ;;  %335 = vmatprep.subr.bf16.mxu1 %v372_v0 }
   0xf   :  { %316 = vmatpush3.bf16.msra.mxu0 %v354_v5  ;;  %336 = vmatpush3.bf16.msra.mxu1 %v363_v13 }
  0x10   :  { %317 = vmatprep.subr.bf16.mxu0 %v372_v0  ;;  %337 = vmatprep.subr.bf16.mxu1 %v372_v0 }
  0x13   :  { %318 = vmatpush3.bf16.msra.mxu0 %v355_v6  ;;  %338 = vmatpush3.bf16.msra.mxu1 %v364_v14 }
  0x14   :  { %319 = vmatprep.subr.bf16.mxu0 %v372_v0  ;;  %339 = vmatprep.subr.bf16.mxu1 %v372_v0 }
  0x17   :  { %320 = vmatpush3.bf16.msra.mxu0 %v356_v7  ;;  %340 = vmatpush3.bf16.msra.mxu1 %v365_v15 }
  0x18   :  { %321 = vmatprep.subr.bf16.mxu0 %v372_v0  ;;  %341 = vmatprep.subr.bf16.mxu1 %v372_v0 }
  0x1b   :  { %322 = vmatpush3.bf16.msra.mxu0 %v357_v8  ;;  %342 = vmatpush3.bf16.msra.mxu1 %v366_v16 }
  0x1c   :  { %323 = vmatprep.subr.bf16.mxu0 %v372_v0  ;;  %343 = vmatprep.subr.bf16.mxu1 %v372_v0 }
  0x1f   :  { %324 = vmatpush3.bf16.msra.mxu0 %v358_v9  ;;  %344 = vmatpush3.bf16.msra.mxu1 %v367_v17 }
  0x22   :  { %326 = vmatmul.mubr.bf16.vlgmr.msra.gmra.mxu0 %v359_v10 }
  0xe2   :  { %v134_v19 = vpop.f32.mrf.mxu0 }
  0xe3   :  { %v135_v20 = vadd.f32 %v270_v18, %v134_v19 }
  0xe4   :  { %v327_v21 = vpop.f32.mrf.mxu0 }
  0xe5   :  { %v143_v22 = vmul.f32 1.442695, %v135_v20  ;;  %vm141_vm1 = vcmp.gt.f32.partialorder %v135_v20, 0.0 }
  0xe6   :  { %v137_v23 = vpop.f32.mrf.mxu0 }
  0xe7   :  { %368 = vpow2.f32 %v143_v22  ;;  %v138_v24 = vadd.f32 %v270_v18, %v137_v23 }
  0xe8   :  { %v328_v25 = vpop.f32.mrf.mxu0 }
  0xe9   :  { %v145_v26 = vmul.f32 1.442695, %v138_v24  ;;  %vm142_vm2 = vcmp.gt.f32.partialorder %v138_v24, 0.0 }
  0xeb   :  { %370 = vpow2.f32 %v145_v26 }
  0xf4   :  { %v369_v27 = vpop.eup %368 }
  0xf5   :  { %v280_v28 = vadd.f32 -1.0, %v369_v27 }
  0xf7   :  { %v149_v31 = vsel %vm141_vm1, %v135_v20, %v280_v28 }
  0xf8   :  { %v371_v29 = vpop.eup %370 }
  0xf9   :  { %v281_v30 = vadd.f32 -1.0, %v371_v29 }
  0xfb   :  { %v150_v32 = vsel %vm142_vm2, %v138_v24, %v281_v30 }
  0xfc   :  { %v151_v33 = vpack.c.bf16 %v150_v32, %v149_v31 }
  0xfe   :  { %346 = vmatmul.mubr.bf16.vlgmr.msra.gmra.mxu1 %v151_v33 }
 0x1be   :  { %v257_v35 = vpop.f32.mrf.mxu1 }
 0x1bf   :  { %v258_v36 = vadd.f32 %v282_v34, %v257_v35 }
 0x1c0   :  { %v347_v37 = vpop.f32.mrf.mxu1 }
 0x1c1   :  { %264 = vst [vmem:[%s472_s5] sm:$0xff] %v258_v36 }
 0x1c2   :  { %v260_v38 = vpop.f32.mrf.mxu1 }
 0x1c3   :  { %v261_v39 = vadd.f32 %v282_v34, %v260_v38 }
 0x1c4   :  { %v348_v40 = vpop.f32.mrf.mxu1 }
 0x1c5   :  { %265 = vst [vmem:[%s472_s5 + $0x8] sm:$0xff] %v261_v39 }

</bundles_post_ra>
